<compile_context>
chip_gen: v7x
topology: tpu7x:2x2x1
jax: 0.10.0
libtpu: 0.0.40
codegen_flags: <defaults>
</compile_context>

<pallas_src>
import functools

import jax
import jax.numpy as jnp
from jax.experimental import pallas as pl
from jax.experimental.pallas import tpu as pltpu

_LANE = 128
_NEG = -1e30                       # pad value for softmax lanes
_VMEM_LIMIT = 32 * 1024 * 1024     # explicit, well above the ~3 MiB footprint


def _round_up(v, m):
    return ((v + m - 1) // m) * m


def _pad2(a, rows, cols, value=0.0):
    return jnp.pad(a, ((0, rows - a.shape[0]), (0, cols - a.shape[1])),
                   constant_values=value)


def _masked_layernorm(x, gamma, beta, f_true, eps=1e-5):
    """LayerNorm over the first f_true lanes of a 128-lane-padded tensor.

    Padded lanes of x / gamma / beta are exactly zero, so padded lanes of the
    result are zero as well (keeps the zero-padding invariant through layers).
    """
    fp = x.shape[-1]
    lane = jax.lax.broadcasted_iota(jnp.int32, (1, fp), 1)
    mask = (lane < f_true).astype(x.dtype)
    mean = jnp.sum(x, axis=-1, keepdims=True) * (1.0 / f_true)
    diff = (x - mean) * mask
    var = jnp.sum(diff * diff, axis=-1, keepdims=True) * (1.0 / f_true)
    return diff * jax.lax.rsqrt(var + eps) * gamma + beta


def _leaky_relu(x, slope=0.01):
    return jnp.where(x >= 0, x, slope * x)


def _log_softmax(x):
    m = jnp.max(x, axis=-1, keepdims=True)
    s = x - m
    return s - jnp.log(jnp.sum(jnp.exp(s), axis=-1, keepdims=True))


# ---------------- kernel 1: support panel  S = X @ W  (bf16 -> f32 acc -> bf16)
def _support_kernel(x_ref, w_ref, out_ref):
    out_ref[...] = jnp.dot(
        x_ref[...], w_ref[...],
        preferred_element_type=jnp.float32).astype(out_ref.dtype)


# ---------------- kernel 2: one GCN layer fused with the next layer's X@W:
#   out[row_tile] = leaky_relu(LN(A[row_tile, :] @ S + b)) @ W_next
def _gcn_layer_kernel(f_true, a_ref, s_ref, b_ref, g_ref, be_ref, wn_ref,
                      out_ref, acc_ref):
    k = pl.program_id(1)

    @pl.when(k == 0)
    def _():
        acc_ref[...] = jnp.zeros_like(acc_ref)

    acc_ref[...] += jnp.dot(a_ref[...], s_ref[...],
                            preferred_element_type=jnp.float32)

    @pl.when(k == pl.num_programs(1) - 1)
    def _():
        h = acc_ref[...] + b_ref[...]
        h = _leaky_relu(_masked_layernorm(h, g_ref[...], be_ref[...], f_true))
        out_ref[...] = jnp.dot(
            h.astype(wn_ref.dtype), wn_ref[...],
            preferred_element_type=jnp.float32).astype(out_ref.dtype)


# ---------------- kernel 3: last GCN layer + linear head + log_softmax mixture
def _head_kernel(f_true, lmbd_ref, a_ref, s_ref, b_ref, g_ref, be_ref,
                 wl_ref, bl_ref, cls_ref, out_ref, acc_ref):
    k = pl.program_id(1)

    @pl.when(k == 0)
    def _():
        acc_ref[...] = jnp.zeros_like(acc_ref)

    acc_ref[...] += jnp.dot(a_ref[...], s_ref[...],
                            preferred_element_type=jnp.float32)

    @pl.when(k == pl.num_programs(1) - 1)
    def _():
        lmbd = lmbd_ref[0, 0]
        h = acc_ref[...] + b_ref[...]
        h = _leaky_relu(_masked_layernorm(h, g_ref[...], be_ref[...], f_true))
        # bl is padded with -1e30 on the padded lanes -> log_softmax stays exact.
        logits = jnp.dot(h.astype(wl_ref.dtype), wl_ref[...],
                         preferred_element_type=jnp.float32) + bl_ref[...]
        gcn_pred = _log_softmax(logits)
        cls_pred = _log_softmax(cls_ref[...])
        out_ref[...] = gcn_pred * lmbd + cls_pred * (1.0 - lmbd)


def type3_forward(x, a1, a2, params, cls_logit, lmbd, *, tile=512):
    """Tiled Pallas forward. Pads nodes / features, runs 3 pallas_calls, slices back."""
    n, f_in = x.shape
    f_mid = params["w1"].shape[1]
    f_half = params["w2"].shape[1]
    f_out = params["wl"].shape[1]

    fp_in = _round_up(f_in, _LANE)
    fp_mid = _round_up(f_mid, _LANE)
    fp_half = _round_up(f_half, _LANE)
    fp_out = _round_up(f_out, _LANE)

    tile = min(tile, _round_up(n, _LANE))
    n_pad = _round_up(n, tile)
    n_rows = n_pad // tile
    n_k = n_pad // tile

    bf16, f32 = jnp.bfloat16, jnp.float32

    # Zero-pad to lane-dense shapes; bf16 for MXU operands only.
    x_p = _pad2(x.astype(f32), n_pad, fp_in).astype(bf16)
    a1_p = _pad2(a1.astype(f32), n_pad, n_pad).astype(bf16)
    a2_p = _pad2(a2.astype(f32), n_pad, n_pad).astype(bf16)
    w1_p = _pad2(params["w1"].astype(f32), fp_in, fp_mid).astype(bf16)
    w2_p = _pad2(params["w2"].astype(f32), fp_mid, fp_half).astype(bf16)
    wl_p = _pad2(params["wl"].astype(f32), fp_half, fp_out).astype(bf16)
    b1_p = _pad2(params["b1"].astype(f32), 1, fp_mid)
    g1_p = _pad2(params["g1"].astype(f32), 1, fp_mid)
    be1_p = _pad2(params["be1"].astype(f32), 1, fp_mid)
    b2_p = _pad2(params["b2"].astype(f32), 1, fp_half)
    g2_p = _pad2(params["g2"].astype(f32), 1, fp_half)
    be2_p = _pad2(params["be2"].astype(f32), 1, fp_half)
    bl_p = _pad2(params["bl"].astype(f32), 1, fp_out, value=_NEG)
    cls_p = _pad2(cls_logit.astype(f32), n_pad, fp_out, value=_NEG)
    lmbd_p = jnp.full((1, 1), lmbd, f32)

    vmem = pltpu.MemorySpace.VMEM
    smem = pltpu.MemorySpace.SMEM

    # ---- pass 1: S1 = X @ W1 (computed once, reused across all row tiles) ----
    s1 = pl.pallas_call(
        _support_kernel,
        out_shape=jax.ShapeDtypeStruct((n_pad, fp_mid), bf16),
        grid_spec=pltpu.PrefetchScalarGridSpec(
            num_scalar_prefetch=0,
            grid=(n_rows,),
            in_specs=[
                pl.BlockSpec((tile, fp_in), lambda i: (i, 0), memory_space=vmem),
                pl.BlockSpec((fp_in, fp_mid), lambda i: (0, 0), memory_space=vmem),
            ],
            out_specs=pl.BlockSpec((tile, fp_mid), lambda i: (i, 0),
                                   memory_space=vmem),
        ),
        compiler_params=pltpu.CompilerParams(
            dimension_semantics=("parallel",),
            vmem_limit_bytes=_VMEM_LIMIT),
    )(x_p, w1_p)

    # ---- pass 2: S2 = leaky_relu(LN(A1 @ S1 + b1)) @ W2 ----------------------
    s2 = pl.pallas_call(
        functools.partial(_gcn_layer_kernel, f_mid),
        out_shape=jax.ShapeDtypeStruct((n_pad, fp_half), bf16),
        grid_spec=pltpu.PrefetchScalarGridSpec(
            num_scalar_prefetch=0,
            grid=(n_rows, n_k),
            in_specs=[
                pl.BlockSpec((tile, tile), lambda i, k: (i, k), memory_space=vmem),
                pl.BlockSpec((tile, fp_mid), lambda i, k: (k, 0), memory_space=vmem),
                pl.BlockSpec((1, fp_mid), lambda i, k: (0, 0), memory_space=vmem),
                pl.BlockSpec((1, fp_mid), lambda i, k: (0, 0), memory_space=vmem),
                pl.BlockSpec((1, fp_mid), lambda i, k: (0, 0), memory_space=vmem),
                pl.BlockSpec((fp_mid, fp_half), lambda i, k: (0, 0), memory_space=vmem),
            ],
            out_specs=pl.BlockSpec((tile, fp_half), lambda i, k: (i, 0),
                                   memory_space=vmem),
            scratch_shapes=[pltpu.VMEM((tile, fp_mid), f32)],
        ),
        compiler_params=pltpu.CompilerParams(
            dimension_semantics=("parallel", "arbitrary"),
            vmem_limit_bytes=_VMEM_LIMIT),
    )(a1_p, s1, b1_p, g1_p, be1_p, w2_p)

    # ---- pass 3: head (GCN2 + LN + linear + log_softmax mixture) -------------
    out_pad = pl.pallas_call(
        functools.partial(_head_kernel, f_half),
        out_shape=jax.ShapeDtypeStruct((n_pad, fp_out), f32),
        grid_spec=pltpu.PrefetchScalarGridSpec(
            num_scalar_prefetch=0,
            grid=(n_rows, n_k),
            in_specs=[
                pl.BlockSpec(memory_space=smem),                                      # lmbd
                pl.BlockSpec((tile, tile), lambda i, k: (i, k), memory_space=vmem),   # A2
                pl.BlockSpec((tile, fp_half), lambda i, k: (k, 0), memory_space=vmem),# S2
                pl.BlockSpec((1, fp_half), lambda i, k: (0, 0), memory_space=vmem),   # b2
                pl.BlockSpec((1, fp_half), lambda i, k: (0, 0), memory_space=vmem),   # g2
                pl.BlockSpec((1, fp_half), lambda i, k: (0, 0), memory_space=vmem),   # be2
                pl.BlockSpec((fp_half, fp_out), lambda i, k: (0, 0), memory_space=vmem),  # Wl
                pl.BlockSpec((1, fp_out), lambda i, k: (0, 0), memory_space=vmem),    # bl
                pl.BlockSpec((tile, fp_out), lambda i, k: (i, 0), memory_space=vmem), # cls
            ],
            out_specs=pl.BlockSpec((tile, fp_out), lambda i, k: (i, 0),
                                   memory_space=vmem),
            scratch_shapes=[pltpu.VMEM((tile, fp_half), f32)],
        ),
        compiler_params=pltpu.CompilerParams(
            dimension_semantics=("parallel", "arbitrary"),
            vmem_limit_bytes=_VMEM_LIMIT),
    )(lmbd_p, a2_p, s2, b2_p, g2_p, be2_p, wl_p, bl_p, cls_p)

    return out_pad[:n, :f_out]


def _reference(x, a1, a2, p, cls_logit, lmbd):
    """Pure-JAX f32 reference for correctness checking."""
    def ln(h, g, b):
        mu = jnp.mean(h, -1, keepdims=True)
        var = jnp.mean((h - mu) ** 2, -1, keepdims=True)
        return (h - mu) / jnp.sqrt(var + 1e-5) * g + b

    def lrelu(h):
        return jnp.where(h >= 0, h, 0.01 * h)

    h = a1 @ (x @ p["w1"]) + p["b1"]
    h = lrelu(ln(h, p["g1"], p["be1"]))
    h = a2 @ (h @ p["w2"]) + p["b2"]
    h = lrelu(ln(h, p["g2"], p["be2"]))
    logits = h @ p["wl"] + p["bl"]
    gcn_pred = jax.nn.log_softmax(logits, axis=1)
    cls_pred = jax.nn.log_softmax(cls_logit, axis=1)
    return gcn_pred * lmbd + cls_pred * (1.0 - lmbd)


if __name__ == "__main__":
    # Small config: N nodes, fan_in=32, fan_mid=32, fan_mid//2=16, fan_out=8
    N, FAN_IN, FAN_MID, FAN_OUT = 8, 32, 32, 8
    FAN_HALF = FAN_MID // 2
    LMBD = 0.7

    key = jax.random.PRNGKey(0)
    ks = jax.random.split(key, 12)

    x = jax.random.normal(ks[0], (N, FAN_IN), jnp.float32)
    # Row-normalized dense "adjacency" matrices (synthetic).
    a1_raw = jnp.abs(jax.random.normal(ks[1], (N, N), jnp.float32)) + jnp.eye(N)
    a1 = a1_raw / jnp.sum(a1_raw, axis=1, keepdims=True)
    a2_raw = jnp.abs(jax.random.normal(ks[2], (N, N), jnp.float32)) + jnp.eye(N)
    a2 = a2_raw / jnp.sum(a2_raw, axis=1, keepdims=True)

    params = {
        "w1": jax.random.normal(ks[3], (FAN_IN, FAN_MID), jnp.float32) * 0.1,
        "b1": jax.random.normal(ks[4], (1, FAN_MID), jnp.float32) * 0.1,
        "g1": jnp.ones((1, FAN_MID), jnp.float32),
        "be1": jnp.zeros((1, FAN_MID), jnp.float32),
        "w2": jax.random.normal(ks[5], (FAN_MID, FAN_HALF), jnp.float32) * 0.1,
        "b2": jax.random.normal(ks[6], (1, FAN_HALF), jnp.float32) * 0.1,
        "g2": jnp.ones((1, FAN_HALF), jnp.float32),
        "be2": jnp.zeros((1, FAN_HALF), jnp.float32),
        "wl": jax.random.normal(ks[7], (FAN_HALF, FAN_OUT), jnp.float32) * 0.1,
        "bl": jax.random.normal(ks[8], (1, FAN_OUT), jnp.float32) * 0.1,
    }
    cls_logit = jax.random.normal(ks[9], (N, FAN_OUT), jnp.float32)

    out = type3_forward(x, a1, a2, params, cls_logit, LMBD)
    out = jax.block_until_ready(out)

    ref = _reference(x, a1, a2, params, cls_logit, LMBD)
    assert out.shape == (N, FAN_OUT)
    # bf16 MXU operands with f32 accumulation -> loosen tolerance vs f32 reference.
    assert jnp.allclose(out, ref, atol=5e-2, rtol=5e-2), "mismatch vs reference"

    # TODO(synk): training-mode dropout is omitted (inference-only forward).
    print("KERNEL_OK")
</pallas_src>

<mosaic_0001>
module attributes {stable_mosaic.version = 11 : i64} {
  func.func @_support_kernel(%arg0: i32, %arg1: memref<128x128xbf16, #tpu.memory_space<vmem>>, %arg2: memref<128x128xbf16, #tpu.memory_space<vmem>>, %arg3: memref<128x128xbf16, #tpu.memory_space<vmem>>) attributes {dimension_semantics = [#tpu.dimension_semantics<parallel>], iteration_bounds = array<i64: 1>, scalar_prefetch = 0 : i64, scratch_operands = 0 : i64, tpu.core_type = #tpu.core_type<tc>, window_params = [{transform_indices = @transform_0, window_bounds = array<i64: 128, 128>}, {pipeline_mode = #tpu.pipeline_mode<synchronous>, transform_indices = @transform_1, window_bounds = array<i64: 128, 128>}, {transform_indices = @transform_2, window_bounds = array<i64: 128, 128>}]} {
    %c0 = arith.constant 0 : index
    %c0_0 = arith.constant 0 : index
    %0 = vector.load %arg1[%c0, %c0_0] : memref<128x128xbf16, #tpu.memory_space<vmem>>, vector<128x128xbf16>
    %c0_1 = arith.constant 0 : index
    %c0_2 = arith.constant 0 : index
    %1 = vector.load %arg2[%c0_1, %c0_2] : memref<128x128xbf16, #tpu.memory_space<vmem>>, vector<128x128xbf16>
    %cst = arith.constant dense<0.000000e+00> : vector<128x128xf32>
    %2 = tpu.matmul %0, %1, %cst {dimension_numbers = #tpu.dot_dimension_numbers<[1], [0], [0], [1], [0, 0, 1, 1], [], []>} : vector<128x128xbf16>, vector<128x128xbf16>, vector<128x128xf32> -> vector<128x128xf32>
    %3 = arith.truncf %2 : vector<128x128xf32> to vector<128x128xbf16>
    %c0_3 = arith.constant 0 : index
    %c0_4 = arith.constant 0 : index
    %4 = vector.load %arg3[%c0_3, %c0_4] : memref<128x128xbf16, #tpu.memory_space<vmem>>, vector<128x128xbf16>
    tpu.vector_store %arg3[%c0_3, %c0_4], %3 {strides = array<i32>} : memref<128x128xbf16, #tpu.memory_space<vmem>>, vector<128x128xbf16>,
    return
  }
  func.func @transform_0(%arg0: i32) -> (i32, i32) {
    %c0_i32 = arith.constant 0 : i32
    %c0_i32_0 = arith.constant 0 : i32
    return %arg0, %c0_i32 : i32, i32
  }
  func.func @transform_1(%arg0: i32) -> (i32, i32) {
    %c0_i32 = arith.constant 0 : i32
    %c0_i32_0 = arith.constant 0 : i32
    %c0_i32_1 = arith.constant 0 : i32
    return %c0_i32, %c0_i32_0 : i32, i32
  }
  func.func @transform_2(%arg0: i32) -> (i32, i32) {
    %c0_i32 = arith.constant 0 : i32
    %c0_i32_0 = arith.constant 0 : i32
    return %arg0, %c0_i32 : i32, i32
  }
}

</mosaic_0001>

<bundles_post_ra>
// kernel: tpu_custom_call.1
= control target key start
LH: loop header
LB: loop body
LE: loop exit
PB: predicated region body
PF: predicated region fallthrough
CT: control target
= control target key end

     0   :  { %7 = vsyncpa [#allocation3], 0  ;;  %s681_s0 = inlined_call_operand.hbm [shape: bf16[128,128], index: 0, kind: input, shape index: {}]   ;;  %s682_s1 = inlined_call_operand.hbm [shape: bf16[128,128], index: 1, kind: input, shape index: {}]   ;;  %s683_s2 = inlined_call_operand.hbm [shape: bf16[128,128], index: 2, kind: output, shape index: {}]  }
   0x1   :  { %8 = vsyncpa [#allocation6], 0 }
   0x2   :  { %9 = vsyncpa [#allocation4], 0  ;;  %s616_s9 = smov [#allocation2]   ;;  %s544_s13 = scalar_lea.hbm %s681_s0, 1024 }
   0x3   :  { %s15_s10 = sshll.u32 %s616_s9, 4  ;;  %p545_p0 = scmp.ne.s32.totalorder %s681_s0, %s544_s13  ;;  %s16_s10 = int_to_ptr.vmem [resolvable:$true] %s15_s10 }
   0x4   :  { %p548_p1 = scmp.lt.u32.totalorder %s544_s13, %s681_s0 }
   0x6   :  { %p550_p2 = pnand %p548_p1, %p545_p0 }
   0x8   :  { %553 = shalt.err (!%p550_p2)
}
   0x9   :  { %s554_s18 = scalar_lea.vmem %s16_s10, 1024  ;;  %p559_p4 = scmp.lt.s32.totalorder %s16_s10, %s16_s10 }
   0xa   :  { %p555_p3 = scmp.ne.s32.totalorder %s16_s10, %s554_s18  ;;  %p560_p5 = scmp.lt.s32.totalorder %s554_s18, %s554_s18 }
   0xc   :  { %p561_p6 = por %p560_p5, %p559_p4 }
   0xe   :  { %p562_p7 = pnand %p561_p6, %p555_p3 }
  0x10   :  { %565 = shalt.err (!%p562_p7)
}
  0x11   :  { %s617_s19 = smov 64   ;;  %s618_s20 = smov 4  }
  0x12   :  { %21 = dma.hbm_to_vmem [thread:$0]  %s681_s0, 1024, %s16_s10, [#allocation3], %s617_s19, %s617_s19, %s618_s20  }
  0x13   :  { %s619_s23 = smov [#allocation5]   ;;  %s566_s27 = scalar_lea.hbm %s682_s1, 1024 }
  0x14   :  { %s27_s24 = sshll.u32 %s619_s23, 4  ;;  %p567_p8 = scmp.ne.s32.totalorder %s682_s1, %s566_s27  ;;  %s28_s24 = int_to_ptr.vmem [resolvable:$true] %s27_s24 }
  0x15   :  { %p570_p9 = scmp.lt.u32.totalorder %s566_s27, %s682_s1 }
  0x17   :  { %p572_p10 = pnand %p570_p9, %p567_p8 }
  0x19   :  { %575 = shalt.err (!%p572_p10)
}
  0x1a   :  { %s576_s4 = scalar_lea.vmem %s28_s24, 1024  ;;  %p581_p12 = scmp.lt.s32.totalorder %s28_s24, %s28_s24 }
  0x1b   :  { %p577_p11 = scmp.ne.s32.totalorder %s28_s24, %s576_s4  ;;  %p582_p13 = scmp.lt.s32.totalorder %s576_s4, %s576_s4 }
  0x1d   :  { %p583_p0 = por %p582_p13, %p581_p12 }
  0x1f   :  { %p584_p1 = pnand %p583_p0, %p577_p11 }
  0x21   :  { %587 = shalt.err (!%p584_p1)
}
  0x22   :  { %33 = dma.hbm_to_vmem [thread:$0]  %s682_s1, 1024, %s28_s24, [#allocation6], %s617_s19, %s617_s19, %s618_s20  }
  0x23   :  { %610 = dma.done.wait [#allocation3], 1024  }
  0x24   :  { %611 = vsyncadd [#allocation3], 4294966272 }
  0x25   :  { %612 = dma.done.wait [#allocation6], 1024  }
  0x26   :  { %613 = vsyncadd [#allocation6], 4294966272  ;;  %v528_v0 = vld [vmem:[#allocation5] sm:$0xff]   ;;  %v529_v1 = vld [vmem:[#allocation5 + $0x8] sm:$0xff]   ;;  %s620_s1 = smov [#allocation7]  }
  0x27   :  { %475 = vmatprep.subr.bf16.mxu0 %v528_v0  ;;  %507 = vmatprep.subr.bf16.mxu1 %v528_v0  ;;  %v530_v2 = vld [vmem:[#allocation5 + $0x10] sm:$0xff]   ;;  %v531_v3 = vld [vmem:[#allocation5 + $0x18] sm:$0xff]   ;;  %v536_v4 = vld [vmem:[#allocation2] sm:$0xff]   ;;  %s351_s6 = sshll.u32 %s620_s1, 4  ;;  %s352_s6 = int_to_ptr.vmem [resolvable:$true] %s351_s6 }
  0x28   :  { %476 = vmatpush3.bf16.msra.mxu0 %v528_v0  ;;  %515 = vmatpush3.bf16.msra.mxu1 %v528_v0  ;;  %v537_v5 = vld [vmem:[#allocation2 + $0x20] sm:$0xff]   ;;  %v533_v7 = vld [vmem:[#allocation5 + $0x28] sm:$0xff]   ;;  %v534_v8 = vld [vmem:[#allocation5 + $0x30] sm:$0xff]   ;;  %s588_s7 = scalar_lea.vmem %s352_s6, 1024  ;;  %p593_p3 = scmp.lt.s32.totalorder %s352_s6, %s352_s6 }
  0x29   :  { %477 = vmatprep.subr.bf16.mxu0 %v529_v1  ;;  %508 = vmatprep.subr.bf16.mxu1 %v529_v1  ;;  %v532_v6 = vld [vmem:[#allocation5 + $0x20] sm:$0xff]   ;;  %v535_v9 = vld [vmem:[#allocation5 + $0x38] sm:$0xff]   ;;  %v538_v10 = vld [vmem:[#allocation2 + $0x8] sm:$0xff]   ;;  %p589_p2 = scmp.ne.s32.totalorder %s352_s6, %s588_s7  ;;  %p594_p4 = scmp.lt.s32.totalorder %s588_s7, %s588_s7 }
  0x2a   :  { %491 = vmatprep.mubr.bf16.mxu0 %v536_v4  ;;  %499 = vmatprep.mubr.bf16.mxu1 %v537_v5  ;;  %v539_v11 = vld [vmem:[#allocation2 + $0x28] sm:$0xff]   ;;  %v540_v12 = vld [vmem:[#allocation2 + $0x10] sm:$0xff]   ;;  %v542_v14 = vld [vmem:[#allocation2 + $0x18] sm:$0xff]  }
  0x2b   :  { %v541_v13 = vld [vmem:[#allocation2 + $0x30] sm:$0xff]   ;;  %v543_v15 = vld [vmem:[#allocation2 + $0x38] sm:$0xff]   ;;  %p595_p5 = por %p594_p4, %p593_p3 }
  0x2c   :  { %478 = vmatpush3.bf16.msra.mxu0 %v529_v1  ;;  %516 = vmatpush3.bf16.msra.mxu1 %v529_v1 }
  0x2d   :  { %479 = vmatprep.subr.bf16.mxu0 %v530_v2  ;;  %509 = vmatprep.subr.bf16.mxu1 %v530_v2  ;;  %p596_p6 = pnand %p595_p5, %p589_p2 }
  0x30   :  { %480 = vmatpush3.bf16.msra.mxu0 %v530_v2  ;;  %517 = vmatpush3.bf16.msra.mxu1 %v530_v2 }
  0x31   :  { %481 = vmatprep.subr.bf16.mxu0 %v531_v3  ;;  %510 = vmatprep.subr.bf16.mxu1 %v531_v3 }
  0x34   :  { %482 = vmatpush3.bf16.msra.mxu0 %v531_v3  ;;  %518 = vmatpush3.bf16.msra.mxu1 %v531_v3 }
  0x35   :  { %483 = vmatprep.subr.bf16.mxu0 %v532_v6  ;;  %511 = vmatprep.subr.bf16.mxu1 %v532_v6 }
  0x38   :  { %484 = vmatpush3.bf16.msra.mxu0 %v532_v6  ;;  %519 = vmatpush3.bf16.msra.mxu1 %v532_v6 }
  0x39   :  { %485 = vmatprep.subr.bf16.mxu0 %v533_v7  ;;  %512 = vmatprep.subr.bf16.mxu1 %v533_v7 }
  0x3c   :  { %486 = vmatpush3.bf16.msra.mxu0 %v533_v7  ;;  %520 = vmatpush3.bf16.msra.mxu1 %v533_v7 }
  0x3d   :  { %487 = vmatprep.subr.bf16.mxu0 %v534_v8  ;;  %513 = vmatprep.subr.bf16.mxu1 %v534_v8 }
  0x40   :  { %488 = vmatpush3.bf16.msra.mxu0 %v534_v8  ;;  %521 = vmatpush3.bf16.msra.mxu1 %v534_v8 }
  0x41   :  { %489 = vmatprep.subr.bf16.mxu0 %v535_v9  ;;  %514 = vmatprep.subr.bf16.mxu1 %v535_v9 }
  0x44   :  { %490 = vmatpush3.bf16.msra.mxu0 %v535_v9  ;;  %522 = vmatpush3.bf16.msra.mxu1 %v535_v9 }
  0x47   :  { %492 = vmatmul.mubr.bf16.vlgmr.msra.gmra.mrb[0].mxu0 %v538_v10  ;;  %500 = vmatmul.mubr.bf16.vlgmr.msra.gmra.mrb[0].mxu1 %v539_v11 }
  0x48   :  { %495 = vmatprep.mubr.bf16.mxu0 %v540_v12  ;;  %503 = vmatprep.mubr.bf16.mxu1 %v541_v13 }
  0x4f   :  { %496 = vmatmul.mubr.bf16.gmra.mrb[4].mxu0 %v542_v14  ;;  %504 = vmatmul.mubr.bf16.gmra.mrb[4].mxu1 %v543_v15 }
 0x11a   :  { %v493_v16 = vpop.f32.mrb[0].mxu0  ;;  %v501_v17 = vpop.f32.mrb[0].mxu1 }
 0x11b   :  { %v203_v18 = vpop.f32.mrb[1].mxu0  ;;  %v235_v19 = vpop.f32.mrb[1].mxu1 }
 0x11c   :  { %v494_v20 = vpop.f32.mrb[2].mxu0  ;;  %v502_v21 = vpop.f32.mrb[2].mxu1 }
 0x11d   :  { %v420_v22 = vpack.c.bf16 %v494_v20, %v493_v16  ;;  %v440_v23 = vpack.c.bf16 %v502_v21, %v501_v17  ;;  %v206_v24 = vpop.f32.mrb[3].mxu0  ;;  %v238_v25 = vpop.f32.mrb[3].mxu1 }
 0x11e   :  { %v415_v26 = vpack.c.bf16 %v206_v24, %v203_v18  ;;  %v435_v27 = vpack.c.bf16 %v238_v25, %v235_v19 }
 0x11f   :  { %452 = vst [vmem:[#allocation7 + $0x8] sm:$0xff] %v420_v22   ;;  %456 = vst [vmem:[#allocation7 + $0x28] sm:$0xff] %v440_v23  }
 0x120   :  { %416 = vst [vmem:[#allocation7] sm:$0xff] %v415_v26   ;;  %455 = vst [vmem:[#allocation7 + $0x20] sm:$0xff] %v435_v27  }
 0x122   :  { %v497_v28 = vpop.f32.mrb[4].mxu0  ;;  %v505_v29 = vpop.f32.mrb[4].mxu1 }
 0x123   :  { %v219_v30 = vpop.f32.mrb[5].mxu0  ;;  %v251_v31 = vpop.f32.mrb[5].mxu1 }
 0x124   :  { %v498_v32 = vpop.f32.mrb[6].mxu0  ;;  %v506_v33 = vpop.f32.mrb[6].mxu1 }
 0x125   :  { %v430_v34 = vpack.c.bf16 %v498_v32, %v497_v28  ;;  %v450_v35 = vpack.c.bf16 %v506_v33, %v505_v29  ;;  %v222_v36 = vpop.f32.mrb[7].mxu0  ;;  %v254_v37 = vpop.f32.mrb[7].mxu1 }
 0x126   :  { %v425_v38 = vpack.c.bf16 %v222_v36, %v219_v30  ;;  %v445_v39 = vpack.c.bf16 %v254_v37, %v251_v31 }
 0x127   :  { %454 = vst [vmem:[#allocation7 + $0x18] sm:$0xff] %v430_v34   ;;  %458 = vst [vmem:[#allocation7 + $0x38] sm:$0xff] %v450_v35  }
 0x128   :  { %453 = vst [vmem:[#allocation7 + $0x10] sm:$0xff] %v425_v38   ;;  %457 = vst [vmem:[#allocation7 + $0x30] sm:$0xff] %v445_v39  }
 0x129   :  { %599 = shalt.err (!%p596_p6)
}
 0x12a   :  { %s600_s10 = scalar_lea.hbm %s683_s2, 1024 }
 0x12b   :  { %p601_p7 = scmp.ne.s32.totalorder %s683_s2, %s600_s10  ;;  %p604_p8 = scmp.lt.u32.totalorder %s600_s10, %s683_s2 }
 0x12d   :  { %p606_p9 = pnand %p604_p8, %p601_p7 }
 0x12f   :  { %609 = shalt.err (!%p606_p9)
}
 0x130   :  { %357 = dma.vmem_to_hbm [thread:$0]  %s352_s6, 1024, %s683_s2, [#allocation4], %s617_s19, %s617_s19, %s618_s20  }
 0x131   :  { %614 = dma.done.wait [#allocation4], 1024  }
 0x132   :  { %615 = vsyncadd [#allocation4], 4294966272 }
 0x133   :  { %361 = vsyncpa [#allocation3], 1 }
 0x134   :  { %362 = vsyncpa [#allocation6], 1 }
 0x135   :  { %363 = vsyncpa [#allocation4], 1 }

</bundles_post_ra>
